<compile_context>
chip_gen: v7x
topology: tpu7x:2x2x1
jax: 0.10.0
libtpu: 0.0.40
codegen_flags: <defaults>
</compile_context>

<pallas_src>
import functools

import jax
import jax.numpy as jnp
from jax.experimental import pallas as pl
from jax.experimental.pallas import tpu as pltpu


def _slownorm_kernel(x_ref, mean_ref, std_ref, y_ref, mu_ref, sd_ref,
                     inv_sc, sum_sc, ssq_sc, *, n_total, factor, training):
    """One (TILE_N, TILE_F) block: normalize + (optionally) accumulate stats."""
    k = pl.program_id(1)                       # batch / reduction axis (innermost)
    k_last = pl.num_programs(1) - 1

    # Hoisted per-feature-block setup: the reciprocal is computed once per
    # feature block (not once per k step) and stays resident in VMEM scratch.
    @pl.when(k == 0)
    def _():
        inv_sc[...] = pl.reciprocal(std_ref[...] + jnp.float32(0.001),
                                    approx=False)
        sum_sc[...] = jnp.zeros_like(sum_sc)
        ssq_sc[...] = jnp.zeros_like(ssq_sc)

    x32 = x_ref[...].astype(jnp.float32)       # (TILE_N, TILE_F)
    d = x32 - mean_ref[...]                    # centered around the running mean
    y_ref[...] = (d * inv_sc[...]).astype(y_ref.dtype)

    if training:
        # Shifted one-pass statistics: accumulate sum(d) and sum(d*d); the
        # running mean is re-added at finalize.  Reuses `d` (x32 dies early).
        sum_sc[...] += jnp.sum(d, axis=0, keepdims=True)
        ssq_sc[...] += jnp.sum(d * d, axis=0, keepdims=True)

        @pl.when(k == k_last)
        def _():
            n = jnp.float32(n_total)
            md = sum_sc[...] * jnp.float32(1.0 / n_total)
            mu_batch = mean_ref[...] + md
            # Unbiased variance of d (== variance of x).  For n_total == 1 this
            # is 0/0 -> nan, matching torch.std(ddof=1).
            var = (ssq_sc[...] - n * md * md) / jnp.float32(n_total - 1)
            var = jnp.maximum(var, 0.0)        # guard cancellation; keeps nan
            sd_batch = jnp.sqrt(var)
            f = jnp.float32(factor)
            one_m_f = jnp.float32(1.0 - factor)
            # EMA buffer update fused into the finalize step.
            mu_ref[...] = one_m_f * mean_ref[...] + f * mu_batch
            sd_ref[...] = one_m_f * std_ref[...] + f * sd_batch
    else:
        @pl.when(k == k_last)
        def _():
            mu_ref[...] = mean_ref[...]
            sd_ref[...] = std_ref[...]


def _choose_tiles(n, f_pad, x_itemsize, budget_bytes):
    """Joint VMEM-budgeted tile selection: feature tile first, then batch."""
    # Bytes per block element: double-buffered x input + double-buffered y
    # output (same dtype) + ~2 live f32 temporaries inside the kernel body.
    per_elem = 4 * max(int(x_itemsize), 1) + 8
    rows_for_f = max(1, min(n, 256))
    tile_f = 128
    for cand in (4096, 2048, 1024, 512, 256, 128):
        if f_pad % cand == 0 and cand * rows_for_f * per_elem <= budget_bytes:
            tile_f = cand
            break

    # Prefer a single reduction step (tile_n == N) whenever it fits: every
    # extra k step costs ~0.35 us fixed overhead on a memory-bound kernel.
    if n * tile_f * per_elem <= budget_bytes:
        tile_n = n
    else:
        tile_n = 0
        for cand in (2048, 1024, 512, 256, 128, 64, 32, 16, 8):
            if n % cand == 0 and cand * tile_f * per_elem <= budget_bytes:
                tile_n = cand
                break
        if tile_n == 0:
            # TODO(synk): pad + mask the batch axis for huge N with no suitable
            # divisor; this full-dimension fallback may exceed the VMEM budget.
            tile_n = n
    return tile_n, tile_f, per_elem


def slownorm_forward(x, mean, std, *, factor=0.05, training=True):
    """Pallas-backed SlowNorm forward.

    Returns (normalized_x, new_mean, new_std).  When training=False the
    buffers pass through unchanged (matching the PyTorch update gate).
    """
    N, F = x.shape

    # Lane-dense padding of the feature axis keeps every output store unmasked.
    F_pad = ((F + 127) // 128) * 128
    pad = F_pad - F
    mean_p = mean.astype(jnp.float32).reshape(1, F)
    std_p = std.astype(jnp.float32).reshape(1, F)
    if pad:
        x_p = jnp.pad(x, ((0, 0), (0, pad)))
        mean_p = jnp.pad(mean_p, ((0, 0), (0, pad)))
        std_p = jnp.pad(std_p, ((0, 0), (0, pad)), constant_values=1.0)
    else:
        x_p = x

    # Generation-aware VMEM budget (64 MiB/TC on v7x, 128 MiB on v5e/v6e).
    vmem_cap = 64 << 20
    try:
        vmem_cap = int(getattr(pltpu.get_tpu_info(), "vmem_capacity_bytes",
                               vmem_cap))
    except Exception:
        pass
    budget = int(vmem_cap * 0.6)

    itemsize = jnp.dtype(x.dtype).itemsize
    tile_n, tile_f, per_elem = _choose_tiles(N, F_pad, itemsize, budget)
    grid = (F_pad // tile_f, N // tile_n)      # reduction (batch) axis last

    blk_bytes = tile_n * tile_f * per_elem + 32 * tile_f * 4 + (2 << 20)
    vmem_limit = int(min(max(blk_bytes, 32 << 20), int(vmem_cap * 0.75)))

    kernel = functools.partial(_slownorm_kernel, n_total=N,
                               factor=float(factor), training=bool(training))

    y_p, mu_p, sd_p = pl.pallas_call(
        kernel,
        out_shape=(
            jax.ShapeDtypeStruct((N, F_pad), x.dtype),
            jax.ShapeDtypeStruct((1, F_pad), jnp.float32),
            jax.ShapeDtypeStruct((1, F_pad), jnp.float32),
        ),
        grid_spec=pltpu.PrefetchScalarGridSpec(
            num_scalar_prefetch=0,
            grid=grid,
            in_specs=[
                pl.BlockSpec((tile_n, tile_f), lambda j, k: (k, j)),
                pl.BlockSpec((1, tile_f), lambda j, k: (0, j)),
                pl.BlockSpec((1, tile_f), lambda j, k: (0, j)),
            ],
            out_specs=(
                pl.BlockSpec((tile_n, tile_f), lambda j, k: (k, j)),
                pl.BlockSpec((1, tile_f), lambda j, k: (0, j)),
                pl.BlockSpec((1, tile_f), lambda j, k: (0, j)),
            ),
            scratch_shapes=[
                pltpu.VMEM((1, tile_f), jnp.float32),   # hoisted 1/(std+eps)
                pltpu.VMEM((1, tile_f), jnp.float32),   # sum(d) accumulator
                pltpu.VMEM((1, tile_f), jnp.float32),   # sum(d*d) accumulator
            ],
        ),
        compiler_params=pltpu.CompilerParams(
            dimension_semantics=("parallel", "arbitrary"),
            vmem_limit_bytes=vmem_limit,
        ),
    )(x_p, mean_p, std_p)

    y = y_p[:, :F] if pad else y_p
    new_mean = mu_p[0, :F]
    new_std = sd_p[0, :F]
    return y, new_mean, new_std


if __name__ == "__main__":
    key = jax.random.PRNGKey(0)
    # Grid-exercising but small: batch=48, features=384 (3 feature tiles).
    N, F = 48, 384
    x = jax.random.normal(key, (N, F), dtype=jnp.float32) * 2.0 + 0.5

    # Buffers as in SlowNorm.__init__: std = ones(features), mean = zeros(features)
    mean = jnp.zeros((F,), dtype=jnp.float32)
    std = jnp.ones((F,), dtype=jnp.float32)

    y, new_mean, new_std = slownorm_forward(x, mean, std, factor=0.05,
                                            training=True)
    jax.block_until_ready((y, new_mean, new_std))

    # Correctness vs. plain-JAX reference.
    y_ref = (x - mean[None, :]) / (std[None, :] + 0.001)
    mu_ref = x.mean(axis=0)
    sd_ref = x.std(axis=0, ddof=1)
    mean_ref = 0.95 * mean + 0.05 * mu_ref
    std_ref = 0.95 * std + 0.05 * sd_ref
    assert jnp.allclose(y, y_ref, atol=1e-4, rtol=1e-4)
    assert jnp.allclose(new_mean, mean_ref, atol=1e-4, rtol=1e-4)
    assert jnp.allclose(new_std, std_ref, atol=1e-4, rtol=1e-4)

    # Eval mode: buffers unchanged, normalization identical.
    y_eval, m_eval, s_eval = slownorm_forward(x, mean, std, training=False)
    jax.block_until_ready((y_eval, m_eval, s_eval))
    assert jnp.allclose(y_eval, y_ref, atol=1e-4, rtol=1e-4)
    assert jnp.allclose(m_eval, mean) and jnp.allclose(s_eval, std)

    # Non-lane-aligned feature count and non-zero buffers: exercises the
    # feature-padding path and the shifted-statistics un-shift.
    N2, F2 = 10, 200
    x2 = jax.random.normal(jax.random.PRNGKey(1), (N2, F2),
                           dtype=jnp.float32) - 1.5
    mean2 = jnp.full((F2,), 0.25, dtype=jnp.float32)
    std2 = jnp.full((F2,), 2.0, dtype=jnp.float32)
    y2, m2, s2 = slownorm_forward(x2, mean2, std2, factor=0.1, training=True)
    jax.block_until_ready((y2, m2, s2))
    y2_ref = (x2 - mean2[None, :]) / (std2[None, :] + 0.001)
    m2_ref = 0.9 * mean2 + 0.1 * x2.mean(axis=0)
    s2_ref = 0.9 * std2 + 0.1 * x2.std(axis=0, ddof=1)
    assert jnp.allclose(y2, y2_ref, atol=1e-4, rtol=1e-4)
    assert jnp.allclose(m2, m2_ref, atol=1e-4, rtol=1e-4)
    assert jnp.allclose(s2, s2_ref, atol=1e-4, rtol=1e-4)

    print("KERNEL_OK")
</pallas_src>

<mosaic_0001>
module attributes {stable_mosaic.version = 11 : i64} {
  func.func @_slownorm_kernel(%arg0: i32, %arg1: i32, %arg2: memref<48x128xf32, #tpu.memory_space<vmem>>, %arg3: memref<1x128xf32, #tpu.memory_space<vmem>>, %arg4: memref<1x128xf32, #tpu.memory_space<vmem>>, %arg5: memref<48x128xf32, #tpu.memory_space<vmem>>, %arg6: memref<1x128xf32, #tpu.memory_space<vmem>>, %arg7: memref<1x128xf32, #tpu.memory_space<vmem>>, %arg8: memref<1x128xf32, #tpu.memory_space<vmem>>, %arg9: memref<1x128xf32, #tpu.memory_space<vmem>>, %arg10: memref<1x128xf32, #tpu.memory_space<vmem>>) attributes {dimension_semantics = [#tpu.dimension_semantics<parallel>, #tpu.dimension_semantics<arbitrary>], iteration_bounds = array<i64: 3, 1>, scalar_prefetch = 0 : i64, scratch_operands = 3 : i64, tpu.core_type = #tpu.core_type<tc>, window_params = [{transform_indices = @transform_0, window_bounds = array<i64: 48, 128>}, {transform_indices = @transform_1, window_bounds = array<i64: 1, 128>}, {transform_indices = @transform_2, window_bounds = array<i64: 1, 128>}, {transform_indices = @transform_3, window_bounds = array<i64: 48, 128>}, {transform_indices = @transform_4, window_bounds = array<i64: 1, 128>}, {transform_indices = @transform_5, window_bounds = array<i64: 1, 128>}]} {
    %c0_i32 = arith.constant 0 : i32
    %0 = arith.cmpi eq, %arg1, %c0_i32 : i32
    %1 = arith.extui %0 : i1 to i32
    %c0_i32_0 = arith.constant 0 : i32
    %2 = arith.cmpi ne, %1, %c0_i32_0 : i32
    scf.if %2 {
      %c0_19 = arith.constant 0 : index
      %c0_20 = arith.constant 0 : index
      %25 = vector.load %arg4[%c0_19, %c0_20] : memref<1x128xf32, #tpu.memory_space<vmem>>, vector<1x128xf32>
      %cst_21 = arith.constant 1.000000e-03 : f32
      %26 = vector.broadcast %cst_21 : f32 to vector<1x128xf32>
      %27 = arith.addf %25, %26 : vector<1x128xf32>
      %28 = tpu.reciprocal %27 : vector<1x128xf32> -> vector<1x128xf32>
      %c0_22 = arith.constant 0 : index
      %c0_23 = arith.constant 0 : index
      %29 = vector.load %arg8[%c0_22, %c0_23] : memref<1x128xf32, #tpu.memory_space<vmem>>, vector<1x128xf32>
      tpu.vector_store %arg8[%c0_22, %c0_23], %28 {strides = array<i32>} : memref<1x128xf32, #tpu.memory_space<vmem>>, vector<1x128xf32>,
      %cst_24 = arith.constant 0.000000e+00 : f32
      %30 = vector.broadcast %cst_24 : f32 to vector<1x128xf32>
      %c0_25 = arith.constant 0 : index
      %c0_26 = arith.constant 0 : index
      %31 = vector.load %arg9[%c0_25, %c0_26] : memref<1x128xf32, #tpu.memory_space<vmem>>, vector<1x128xf32>
      tpu.vector_store %arg9[%c0_25, %c0_26], %30 {strides = array<i32>} : memref<1x128xf32, #tpu.memory_space<vmem>>, vector<1x128xf32>,
      %cst_27 = arith.constant 0.000000e+00 : f32
      %32 = vector.broadcast %cst_27 : f32 to vector<1x128xf32>
      %c0_28 = arith.constant 0 : index
      %c0_29 = arith.constant 0 : index
      %33 = vector.load %arg10[%c0_28, %c0_29] : memref<1x128xf32, #tpu.memory_space<vmem>>, vector<1x128xf32>
      tpu.vector_store %arg10[%c0_28, %c0_29], %32 {strides = array<i32>} : memref<1x128xf32, #tpu.memory_space<vmem>>, vector<1x128xf32>,
    } else {
    }
    %c0 = arith.constant 0 : index
    %c0_1 = arith.constant 0 : index
    %3 = vector.load %arg2[%c0, %c0_1] : memref<48x128xf32, #tpu.memory_space<vmem>>, vector<48x128xf32>
    %c0_2 = arith.constant 0 : index
    %c0_3 = arith.constant 0 : index
    %4 = vector.load %arg3[%c0_2, %c0_3] : memref<1x128xf32, #tpu.memory_space<vmem>>, vector<1x128xf32>
    %5 = vector.broadcast %4 : vector<1x128xf32> to vector<48x128xf32>
    %6 = arith.subf %3, %5 : vector<48x128xf32>
    %c0_4 = arith.constant 0 : index
    %c0_5 = arith.constant 0 : index
    %7 = vector.load %arg8[%c0_4, %c0_5] : memref<1x128xf32, #tpu.memory_space<vmem>>, vector<1x128xf32>
    %8 = vector.broadcast %7 : vector<1x128xf32> to vector<48x128xf32>
    %9 = arith.mulf %6, %8 : vector<48x128xf32>
    %c0_6 = arith.constant 0 : index
    %c0_7 = arith.constant 0 : index
    %10 = vector.load %arg5[%c0_6, %c0_7] : memref<48x128xf32, #tpu.memory_space<vmem>>, vector<48x128xf32>
    tpu.vector_store %arg5[%c0_6, %c0_7], %9 {strides = array<i32>} : memref<48x128xf32, #tpu.memory_space<vmem>>, vector<48x128xf32>,
    %c0_8 = arith.constant 0 : index
    %c0_9 = arith.constant 0 : index
    %11 = vector.load %arg9[%c0_8, %c0_9] : memref<1x128xf32, #tpu.memory_space<vmem>>, vector<1x128xf32>
    %cst = arith.constant dense<0.000000e+00> : vector<128xf32>
    %12 = vector.multi_reduction <add>, %6, %cst [0] : vector<48x128xf32> to vector<128xf32>
    %13 = vector.shape_cast %12 : vector<128xf32> to vector<1x128xf32>
    %14 = arith.addf %11, %13 : vector<1x128xf32>
    %c0_10 = arith.constant 0 : index
    %c0_11 = arith.constant 0 : index
    %15 = vector.load %arg9[%c0_10, %c0_11] : memref<1x128xf32, #tpu.memory_space<vmem>>, vector<1x128xf32>
    tpu.vector_store %arg9[%c0_10, %c0_11], %14 {strides = array<i32>} : memref<1x128xf32, #tpu.memory_space<vmem>>, vector<1x128xf32>,
    %c0_12 = arith.constant 0 : index
    %c0_13 = arith.constant 0 : index
    %16 = vector.load %arg10[%c0_12, %c0_13] : memref<1x128xf32, #tpu.memory_space<vmem>>, vector<1x128xf32>
    %17 = arith.mulf %6, %6 : vector<48x128xf32>
    %cst_14 = arith.constant dense<0.000000e+00> : vector<128xf32>
    %18 = vector.multi_reduction <add>, %17, %cst_14 [0] : vector<48x128xf32> to vector<128xf32>
    %19 = vector.shape_cast %18 : vector<128xf32> to vector<1x128xf32>
    %20 = arith.addf %16, %19 : vector<1x128xf32>
    %c0_15 = arith.constant 0 : index
    %c0_16 = arith.constant 0 : index
    %21 = vector.load %arg10[%c0_15, %c0_16] : memref<1x128xf32, #tpu.memory_space<vmem>>, vector<1x128xf32>
    tpu.vector_store %arg10[%c0_15, %c0_16], %20 {strides = array<i32>} : memref<1x128xf32, #tpu.memory_space<vmem>>, vector<1x128xf32>,
    %c0_i32_17 = arith.constant 0 : i32
    %22 = arith.cmpi eq, %arg1, %c0_i32_17 : i32
    %23 = arith.extui %22 : i1 to i32
    %c0_i32_18 = arith.constant 0 : i32
    %24 = arith.cmpi ne, %23, %c0_i32_18 : i32
    scf.if %24 {
      %c0_19 = arith.constant 0 : index
      %c0_20 = arith.constant 0 : index
      %25 = vector.load %arg9[%c0_19, %c0_20] : memref<1x128xf32, #tpu.memory_space<vmem>>, vector<1x128xf32>
      %cst_21 = arith.constant 0.020833334 : f32
      %26 = vector.broadcast %cst_21 : f32 to vector<1x128xf32>
      %27 = arith.mulf %25, %26 : vector<1x128xf32>
      %c0_22 = arith.constant 0 : index
      %c0_23 = arith.constant 0 : index
      %28 = vector.load %arg3[%c0_22, %c0_23] : memref<1x128xf32, #tpu.memory_space<vmem>>, vector<1x128xf32>
      %29 = arith.addf %28, %27 : vector<1x128xf32>
      %c0_24 = arith.constant 0 : index
      %c0_25 = arith.constant 0 : index
      %30 = vector.load %arg10[%c0_24, %c0_25] : memref<1x128xf32, #tpu.memory_space<vmem>>, vector<1x128xf32>
      %cst_26 = arith.constant 4.800000e+01 : f32
      %31 = vector.broadcast %cst_26 : f32 to vector<1x128xf32>
      %32 = arith.mulf %31, %27 : vector<1x128xf32>
      %33 = arith.mulf %32, %27 : vector<1x128xf32>
      %34 = arith.subf %30, %33 : vector<1x128xf32>
      %cst_27 = arith.constant 4.700000e+01 : f32
      %35 = vector.broadcast %cst_27 : f32 to vector<1x128xf32>
      %36 = arith.divf %34, %35 : vector<1x128xf32>
      %cst_28 = arith.constant 0.000000e+00 : f32
      %37 = vector.broadcast %cst_28 : f32 to vector<1x128xf32>
      %38 = arith.maximumf %36, %37 : vector<1x128xf32>
      %39 = math.sqrt %38 : vector<1x128xf32>
      %c0_29 = arith.constant 0 : index
      %c0_30 = arith.constant 0 : index
      %40 = vector.load %arg3[%c0_29, %c0_30] : memref<1x128xf32, #tpu.memory_space<vmem>>, vector<1x128xf32>
      %cst_31 = arith.constant 0.949999988 : f32
      %41 = vector.broadcast %cst_31 : f32 to vector<1x128xf32>
      %42 = arith.mulf %41, %40 : vector<1x128xf32>
      %cst_32 = arith.constant 5.000000e-02 : f32
      %43 = vector.broadcast %cst_32 : f32 to vector<1x128xf32>
      %44 = arith.mulf %43, %29 : vector<1x128xf32>
      %45 = arith.addf %42, %44 : vector<1x128xf32>
      %c0_33 = arith.constant 0 : index
      %c0_34 = arith.constant 0 : index
      %46 = vector.load %arg6[%c0_33, %c0_34] : memref<1x128xf32, #tpu.memory_space<vmem>>, vector<1x128xf32>
      tpu.vector_store %arg6[%c0_33, %c0_34], %45 {strides = array<i32>} : memref<1x128xf32, #tpu.memory_space<vmem>>, vector<1x128xf32>,
      %c0_35 = arith.constant 0 : index
      %c0_36 = arith.constant 0 : index
      %47 = vector.load %arg4[%c0_35, %c0_36] : memref<1x128xf32, #tpu.memory_space<vmem>>, vector<1x128xf32>
      %cst_37 = arith.constant 0.949999988 : f32
      %48 = vector.broadcast %cst_37 : f32 to vector<1x128xf32>
      %49 = arith.mulf %48, %47 : vector<1x128xf32>
      %cst_38 = arith.constant 5.000000e-02 : f32
      %50 = vector.broadcast %cst_38 : f32 to vector<1x128xf32>
      %51 = arith.mulf %50, %39 : vector<1x128xf32>
      %52 = arith.addf %49, %51 : vector<1x128xf32>
      %c0_39 = arith.constant 0 : index
      %c0_40 = arith.constant 0 : index
      %53 = vector.load %arg7[%c0_39, %c0_40] : memref<1x128xf32, #tpu.memory_space<vmem>>, vector<1x128xf32>
      tpu.vector_store %arg7[%c0_39, %c0_40], %52 {strides = array<i32>} : memref<1x128xf32, #tpu.memory_space<vmem>>, vector<1x128xf32>,
    } else {
    }
    return
  }
  func.func @transform_0(%arg0: i32, %arg1: i32) -> (i32, i32) {
    %c0_i32 = arith.constant 0 : i32
    return %arg1, %arg0 : i32, i32
  }
  func.func @transform_1(%arg0: i32, %arg1: i32) -> (i32, i32) {
    %c0_i32 = arith.constant 0 : i32
    %c0_i32_0 = arith.constant 0 : i32
    return %c0_i32, %arg0 : i32, i32
  }
  func.func @transform_2(%arg0: i32, %arg1: i32) -> (i32, i32) {
    %c0_i32 = arith.constant 0 : i32
    %c0_i32_0 = arith.constant 0 : i32
    return %c0_i32, %arg0 : i32, i32
  }
  func.func @transform_3(%arg0: i32, %arg1: i32) -> (i32, i32) {
    %c0_i32 = arith.constant 0 : i32
    return %arg1, %arg0 : i32, i32
  }
  func.func @transform_4(%arg0: i32, %arg1: i32) -> (i32, i32) {
    %c0_i32 = arith.constant 0 : i32
    %c0_i32_0 = arith.constant 0 : i32
    return %c0_i32, %arg0 : i32, i32
  }
  func.func @transform_5(%arg0: i32, %arg1: i32) -> (i32, i32) {
    %c0_i32 = arith.constant 0 : i32
    %c0_i32_0 = arith.constant 0 : i32
    return %c0_i32, %arg0 : i32, i32
  }
}

</mosaic_0001>

<bundles_post_ra>
// kernel: tpu_custom_call.1
= control target key start
LH: loop header
LB: loop body
LE: loop exit
PB: predicated region body
PF: predicated region fallthrough
CT: control target
= control target key end

     0   :  { %11 = vsyncpa [#allocation6], 0  ;;  %s1198_s0 = inlined_call_operand.hbm [shape: f32[48,384], index: 0, kind: input, shape index: {}]   ;;  %s1199_s1 = inlined_call_operand.vmem [shape: f32[1,384], index: 1, kind: input, shape index: {}]   ;;  %s1200_s2 = inlined_call_operand.vmem [shape: f32[1,384], index: 2, kind: input, shape index: {}]   ;;  %s1201_s3 = inlined_call_operand.hbm [shape: f32[48,384], index: 3, kind: output, shape index: {0}]   ;;  %s1202_s4 = inlined_call_operand.hbm [shape: f32[1,384], index: 4, kind: output, shape index: {1}]   ;;  %s1203_s5 = inlined_call_operand.hbm [shape: f32[1,384], index: 5, kind: output, shape index: {2}]  }
   0x1   :  { %13 = vsyncpa [#allocation6 + $0x1], 0 }
   0x2   :  { %14 = vsyncpa [#allocation7], 0 }
   0x3   :  { %16 = vsyncpa [#allocation7 + $0x1], 0 }
   0x4   :  { %17 = vsyncpa [#allocation10], 0 }
   0x5   :  { %19 = vsyncpa [#allocation10 + $0x1], 0  ;;  %s938_s18 = smov 0   ;;  %s940_s19 = smov 0  }
   0x6   :  { %s942_s20 = smov 0   ;;  %s944_s21 = smov 0  }
   0x7   :  { %s946_s22 = smov 0   ;;  %s948_s23 = smov 0  }
   0x8 LB: > { %s969_s24 = sadd.s32 4294967295, %s895_s23   ;;  %s1204_s25 = sadd.s32 4294967294, %s895_s23   ;;  %s895_s23 = sphi %s948_s23, %s25_s23   ;;  %s891_s22 = sphi %s946_s22, %s1218_s22   ;;  %s887_s21 = sphi %s944_s21, %s1217_s21   ;;  %s883_s20 = sphi %s942_s20, %s1216_s20   ;;  %s879_s19 = sphi %s940_s19, %s1215_s19   ;;  %s875_s18 = sphi %s938_s18, %s1214_s18  }
   0x9   : > { %s37_s26 = sadd.s32 1, %s891_s22  ;;  %s46_s27 = sadd.s32 1, %s883_s20 }
   0xa   : > { %p39_p0 = scmp.ge.s32.totalorder %s37_s26, 3  ;;  %p53_p1 = scmp.ne.s32.totalorder %s883_s20, %s879_s19 }
   0xb   : > { %p54_p2 = scmp.eq.s32.totalorder %s895_s23, 0  ;;  %p59_p3 = scmp.ne.s32.totalorder %s879_s19, %s875_s18 }
   0xc   : > { %s1220_s26 = smov (%p39_p0, %s37_s26), 0  ;;  %p60_p5 = scmp.eq.s32.totalorder %s969_s24, 0 }
   0xd   : > { %p981_p4 = por %p54_p2, %p53_p1  ;;  %s42_s29 = ssub.s32 %s891_s22, %s1220_s26 }
   0xe   : > { %p137_p6 = scmp.eq.s32.totalorder %s969_s24, 2  ;;  %p44_p7 = scmp.eq.s32.totalorder %s42_s29, 0 }
   0xf   : > { %p989_p8 = por %p60_p5, %p59_p3  ;;  %p143_p10 = scmp.eq.s32.totalorder %s1204_s25, 2 }
  0x10   : > { %p993_p9 = por %p137_p6, %p53_p1  ;;  %p662_p12 = scmp.lt.s32.totalorder %s895_s23, 3 }
  0x11   : > { %s1000_s7 = scalar_select %p44_p7, %s883_s20, %s46_s27  }
  0x12   : > { %s1208_s6 = scalar_select %p993_p9, 1, 0 }
  0x13   : > { %p1002_p11 = por %p143_p10, %p59_p3  ;;  %s215_s9 = sand.u32 1, %s883_s20  }
  0x14   : > { %s638_s10 = smul.u32 48, %s215_s9  ;;  %s629_s11 = sshll.u32 %s891_s22, 7 }
  0x15   : > { %s1209_s8 = scalar_select %p1002_p11, 1, 0 }
  0x16   : > { %p1011_p13 = pnand %p662_p12, %p981_p4  ;;  %s1018_s15 = scalar_lea.hbm %s1198_s0, %s629_s11 }
  0x17   : > { %s219_s16 = scalar_lea.vmem [#allocation5], %s638_s10  ;;  %s1022_s27 = scalar_lea.sflag [#allocation6], %s215_s9 }
  0x18   : > { %s228_s17 = sshll.u32 %s219_s16, 4  ;;  %s723_s28 = scalar_lea.hbm %s1018_s15, 768  ;;  %s1020_s17 = int_to_ptr.vmem [resolvable:$true] %s228_s17 }
  0x19   : > { %p724_p0 = scmp.ne.s32.totalorder %s1018_s15, %s723_s28  ;;  %p725_p1 = pneg %p1011_p13 }
  0x1a   : > { %s728_s13 = scalar_lea.hbm %s1198_s0, 2304  ;;  %p729_p4 = scmp.lt.u32.totalorder %s1018_s15, %s1198_s0 }
  0x1b   : > { %p726_p2 = pnand %p725_p1, %p724_p0  ;;  %p730_p5 = scmp.lt.u32.totalorder %s728_s13, %s723_s28 }
  0x1c   : > { %p732_p7 = scmp.lt.u32.totalorder %s723_s28, %s1018_s15 }
  0x1d   : > { %p727_p3 = pneg %p726_p2  ;;  %p731_p6 = por %p730_p5, %p729_p4 }
  0x1f   : > { %p733_p10 = por %p732_p7, %p731_p6 }
  0x21   : > { %p734_p12 = pnand %p733_p10, %p727_p3 }
  0x23   : > { %737 = shalt.err (!%p734_p12)
}
  0x24   : > { %s738_s9 = scalar_lea.vmem %s1020_s17, 768  ;;  %s897_s10 = smov [#allocation5]  }
  0x25   : > { %p739_p0 = scmp.ne.s32.totalorder %s1020_s17, %s738_s9  ;;  %s743_s16 = sshll.u32 %s897_s10, 4  ;;  %s744_s16 = int_to_ptr.vmem [resolvable:$false] %s743_s16 }
  0x26   : > { %s745_s25 = scalar_lea.vmem %s744_s16, 1536  ;;  %p746_p9 = scmp.lt.s32.totalorder %s1020_s17, %s744_s16 }
  0x27   : > { %p741_p2 = pnand %p739_p0, %p725_p1  ;;  %p747_p4 = scmp.lt.s32.totalorder %s745_s25, %s738_s9 }
  0x29   : > { %p742_p11 = pneg %p741_p2  ;;  %p748_p5 = por %p747_p4, %p746_p9 }
  0x2b   : > { %p749_p6 = pnand %p748_p5, %p742_p11 }
  0x2d   : > { %752 = shalt.err (!%p749_p6)
}
  0x2e   : > { %s898_s28 = smov 384   ;;  %s899_s29 = smov 128  }
  0x2f   : > { %s900_s11 = smov 8   ;;  %p630_p1 = scmp.ge.s32.totalorder %s895_s23, 1 }
  0x30   : > { %651 = dma.hbm_to_vmem [thread:$0]  (!%p1011_p13), %s1018_s15, 768, %s1020_s17, %s1022_s27, %s898_s28, %s899_s29, %s900_s11  }
  0x31   : > { %p248_p3 = scmp.lt.s32.totalorder %s895_s23, 4 }
  0x33   : > { %p249_p7 = pnand %p630_p1, %p248_p3 }
  0x34   : > { %s1053_s13 = sand.u32 (!%p249_p7), 1, %s879_s19  }
  0x35   : > { %252 = sbr.rel (%p249_p7) target bundleno = 169 (0xa9), region = 32  ;;  %s255_s9 = scalar_lea.sflag (!%p249_p7), [#allocation6], %s1053_s13 }
  0x36   : > { %s639_s14 = smul.u32 (!%p249_p7), 48, %s1053_s13 }
  0x38   : > { %s258_s10 = scalar_lea.vmem (!%p249_p7), [#allocation5], %s639_s14 }
  0x3c   : > { %862 = dma.done.wait (%p989_p8), %s255_s9, 768  }
  0x3d   : > { %864 = vsyncadd (%p989_p8), %s255_s9, 4294966528  ;;  %p300_p9 = scmp.lt.s32.totalorder %s887_s21, 2  ;;  %v901_v0 = vmov 0.0   ;;  %v317_v1 = vld [vmem:[%s258_s10] sm:$0xff]  ;;  %v318_v2 = vld [vmem:[%s258_s10 + $0x8] sm:$0xff]  ;;  %s286_s28 = scalar_lea.vmem [#allocation8], %s639_s14 }
  0x3e   : > { %315 = vst [vmem:[#allocation3] sm:$0x1] %v901_v0  ;;  %316 = vst [vmem:[#allocation4] sm:$0x1] %v901_v0  ;;  %v319_v3 = vld [vmem:[%s258_s10 + $0x10] sm:$0xff]  ;;  %v320_v4 = vld [vmem:[%s258_s10 + $0x18] sm:$0xff] }
  0x3f   : > { %s301_s12 = scalar_select %p300_p9, %s887_s21, 2  ;;  %v321_v10 = vld [vmem:[%s258_s10 + $0x20] sm:$0xff]  ;;  %v322_v17 = vld [vmem:[%s258_s10 + $0x28] sm:$0xff] }
  0x40   : > { %s443_s29 = sshll.u32 %s286_s28, 4  ;;  %s633_s11 = sshll.u32 %s887_s21, 7  ;;  %s1080_s29 = int_to_ptr.vmem [resolvable:$true] %s443_s29 }
  0x41   : > { %s1068_s27 = scalar_lea.vmem %s1199_s1, %s301_s12  ;;  %s1073_s30 = scalar_lea.vmem %s1200_s2, %s301_s12 }
  0x42   : > { %v631_v5 = vld [vmem:[%s1068_s27] ss:$0 sm:$0xff]  ;;  %s1085_s12 = scalar_lea.hbm %s1201_s3, %s633_s11  ;;  %s420_s14 = scalar_lea.sflag [#allocation7], %s1053_s13 }
  0x43   : > { %v330_v6 = vsub.f32 %v317_v1, %v631_v5  ;;  %v331_v7 = vsub.f32 %v318_v2, %v631_v5  ;;  %v332_v8 = vsub.f32 %v319_v3, %v631_v5  ;;  %v311_v9 = vld [vmem:[%s1073_s30] sm:$0x1]  ;;  %v333_v11 = vsub.f32 %v320_v4, %v631_v5  ;;  %s753_s15 = scalar_lea.vmem %s1080_s29, 768  ;;  %p1211_p11 = scmp.ne.s32.totalorder %s1208_s6, 0 }
  0x44   : > { %v312_v12 = vadd.f32 0.001, %v311_v9  ;;  %v334_v18 = vsub.f32 %v321_v10, %v631_v5  ;;  %v335_v22 = vsub.f32 %v322_v17, %v631_v5  ;;  %p754_p8 = scmp.ne.s32.totalorder %s1080_s29, %s753_s15  ;;  %s902_s17 = smov [#allocation8]  }
  0x45   : > { %v356_v13 = vadd.f32 %v331_v7, %v330_v6  ;;  %v370_v14 = vmul.f32 %v330_v6, %v330_v6  ;;  %v371_v15 = vmul.f32 %v331_v7, %v331_v7  ;;  %v372_v16 = vmul.f32 %v332_v8, %v332_v8  ;;  %v355_v42 = vld [vmem:[#allocation3] sm:$0x1]  ;;  %v369_v48 = vld [vmem:[#allocation4] sm:$0x1]  ;;  %s757_s16 = sshll.u32 %s902_s17, 4  ;;  %s758_s16 = int_to_ptr.vmem [resolvable:$false] %s757_s16 }
  0x46   : > { %719 = vrcp.f32 %v312_v12  ;;  %v373_v20 = vmul.f32 %v333_v11, %v333_v11  ;;  %v374_v24 = vmul.f32 %v334_v18, %v334_v18  ;;  %v375_v27 = vmul.f32 %v335_v22, %v335_v22  ;;  %p755_p13 = pnand %p754_p8, %p1211_p11  ;;  %s759_s25 = scalar_lea.vmem %s758_s16, 1536 }
  0x47   : > { %v357_v19 = vadd.f32 %v356_v13, %v332_v8  ;;  %v376_v21 = vadd.f32 %v371_v15, %v370_v14  ;;  %p760_p12 = scmp.lt.s32.totalorder %s1080_s29, %s758_s16  ;;  %p761_p0 = scmp.lt.s32.totalorder %s759_s25, %s753_s15 }
  0x48   : > { %p756_p10 = pneg %p755_p13 }
  0x49   : > { %v358_v23 = vadd.f32 %v357_v19, %v333_v11  ;;  %v377_v25 = vadd.f32 %v376_v21, %v372_v16  ;;  %p762_p2 = por %p761_p0, %p760_p12 }
  0x4b   : > { %v359_v26 = vadd.f32 %v358_v23, %v334_v18  ;;  %v378_v28 = vadd.f32 %v377_v25, %v373_v20  ;;  %p763_p4 = pnand %p762_p2, %p756_p10 }
  0x4d   : > { %v360_v29 = vadd.f32 %v359_v26, %v335_v22  ;;  %v379_v30 = vadd.f32 %v378_v28, %v374_v24 }
  0x4f   : > { %v361_v31 = vrot.slane %v360_v29, 4  ;;  %v380_v32 = vadd.f32 %v379_v30, %v375_v27 }
  0x50   : > { %v720_v33 = vpop.eup %719 }
  0x51   : > { %v362_v34 = vadd.f32 %v361_v31, %v360_v29  ;;  %v381_v35 = vrot.slane %v380_v32, 4  ;;  %314 = vst [vmem:[#allocation2] sm:$0x1] %v720_v33 }
  0x53   : > { %v363_v36 = vrot.slane %v362_v34, 2  ;;  %v382_v37 = vadd.f32 %v381_v35, %v380_v32 }
  0x55   : > { %v364_v38 = vadd.f32 %v363_v36, %v362_v34  ;;  %v383_v39 = vrot.slane %v382_v37, 2 }
  0x57   : > { %v365_v40 = vrot.slane %v364_v38, 1  ;;  %v384_v41 = vadd.f32 %v383_v39, %v382_v37 }
  0x58   : > { %v632_v43 = vld [vmem:[#allocation2] ss:$0 sm:$0xff] }
  0x59   : > { %v366_v44 = vadd.f32 %v365_v40, %v364_v38  ;;  %v385_v45 = vrot.slane %v384_v41, 1  ;;  %v343_v46 = vmul.f32 %v632_v43, %v330_v6  ;;  %v344_v47 = vmul.f32 %v632_v43, %v331_v7 }
  0x5a   : > { %v345_v49 = vmul.f32 %v632_v43, %v332_v8  ;;  %v346_v50 = vmul.f32 %v632_v43, %v333_v11  ;;  %v347_v51 = vmul.f32 %v632_v43, %v334_v18  ;;  %v348_v52 = vmul.f32 %v632_v43, %v335_v22 }
  0x5b   : > { %v367_v53 = vadd.f32 %v366_v44, %v355_v42  ;;  %v386_v54 = vadd.f32 %v385_v45, %v384_v41  ;;  %349 = vst [vmem:[%s286_s28] sm:$0xff] %v343_v46  ;;  %350 = vst [vmem:[%s286_s28 + $0x8] sm:$0xff] %v344_v47 }
  0x5c   : > { %351 = vst [vmem:[%s286_s28 + $0x10] sm:$0xff] %v345_v49  ;;  %352 = vst [vmem:[%s286_s28 + $0x18] sm:$0xff] %v346_v50 }
  0x5d   : > { %353 = vst [vmem:[%s286_s28 + $0x20] sm:$0xff] %v347_v51  ;;  %354 = vst [vmem:[%s286_s28 + $0x28] sm:$0xff] %v348_v52  ;;  %v387_v55 = vadd.f32 %v386_v54, %v369_v48 }
  0x5e   : > { %368 = vst [vmem:[#allocation3] sm:$0x1] %v367_v53 }
  0x5f   : > { %766 = shalt.err (!%p763_p4)
}
  0x60   : > { %s767_s28 = scalar_lea.hbm %s1085_s12, 768  ;;  %s771_s10 = scalar_lea.hbm %s1201_s3, 2304 }
  0x61   : > { %p768_p5 = scmp.ne.s32.totalorder %s1085_s12, %s767_s28  ;;  %p772_p3 = scmp.lt.u32.totalorder %s1085_s12, %s1201_s3 }
  0x62   : > { %p773_p7 = scmp.lt.u32.totalorder %s771_s10, %s767_s28  ;;  %p775_p8 = scmp.lt.u32.totalorder %s767_s28, %s1085_s12 }
  0x63   : > { %p769_p6 = pnand %p768_p5, %p1211_p11 }
  0x64   : > { %p774_p9 = por %p773_p7, %p772_p3 }
  0x65   : > { %p770_p1 = pneg %p769_p6 }
  0x66   : > { %p776_p13 = por %p775_p8, %p774_p9 }
  0x68   : > { %p777_p10 = pnand %p776_p13, %p770_p1 }
  0x6a   : > { %780 = shalt.err (!%p777_p10)
}
  0x6b   : > { %s903_s15 = smov 128   ;;  %s904_s25 = smov 384   ;;  %388 = vst [vmem:[#allocation4] sm:$0x1] %v387_v55  ;;  %v392_v56 = vld [vmem:[#allocation3] sm:$0x1] }
  0x6c   : > { %s905_s11 = smov 8   ;;  %v394_v57 = vld [vmem:[%s1068_s27] sm:$0x1]  ;;  %v393_v58 = vmul.f32 0.020833334, %v392_v56  ;;  %s292_s28 = scalar_lea.vmem [#allocation9], %s1053_s13 }
  0x6d   : > { %642 = dma.vmem_to_hbm [thread:$0]  (%p1211_p11), %s1080_s29, 768, %s1085_s12, %s420_s14, %s903_s15, %s904_s25, %s905_s11   ;;  %v410_v61 = vmul.f32 0.95, %v394_v57 }
  0x6e   : > { %v395_v59 = vadd.f32 %v394_v57, %v393_v58  ;;  %v397_v60 = vmul.f32 48.0, %v393_v58  ;;  %s459_s9 = sshll.u32 %s292_s28, 4  ;;  %s424_s10 = sand.u32 1, %s969_s24   ;;  %s1115_s9 = int_to_ptr.vmem [resolvable:$true] %s459_s9 }
  0x6f   : > { %s634_s17 = sshll.u32 %s887_s21, 4  ;;  %s1124_s14 = scalar_lea.sflag [#allocation10], %s424_s10 }
  0x70   : > { %v398_v63 = vmul.f32 %v397_v60, %v393_v58  ;;  %v411_v0 = vmul.f32 0.05, %v395_v59  ;;  %s1122_s12 = scalar_lea.hbm %s1202_s4, %s634_s17  ;;  %s781_s24 = scalar_lea.vmem %s1115_s9, 16 }
  0x71   : > { %p782_p12 = scmp.ne.s32.totalorder %s1115_s9, %s781_s24  ;;  %s906_s16 = smov [#allocation9]  }
  0x72   : > { %v396_v62 = vld [vmem:[#allocation4] sm:$0x1]  ;;  %v412_v2 = vadd.f32 %v411_v0, %v410_v61  ;;  %s785_s15 = sshll.u32 %s906_s16, 4  ;;  %s786_s15 = int_to_ptr.vmem [resolvable:$false] %s785_s15 }
  0x73   : > { %v399_v1 = vsub.f32 %v396_v62, %v398_v63  ;;  %p783_p0 = pnand %p782_p12, %p1211_p11  ;;  %s787_s25 = scalar_lea.vmem %s786_s15, 32 }
  0x74   : > { %413 = vst [vmem:[%s292_s28] sm:$0x1] %v412_v2  ;;  %p788_p4 = scmp.lt.s32.totalorder %s1115_s9, %s786_s15  ;;  %p789_p5 = scmp.lt.s32.totalorder %s787_s25, %s781_s24 }
  0x75   : > { %v401_v3 = vmul.f32 0.021276595, %v399_v1  ;;  %p784_p2 = pneg %p783_p0 }
  0x76   : > { %p790_p6 = por %p789_p5, %p788_p4 }
  0x78   : > { %p791_p1 = pnand %p790_p6, %p784_p2 }
  0x7a   : > { %794 = shalt.err (!%p791_p1)
}
  0x7b   : > { %s795_s11 = scalar_lea.hbm %s1122_s12, 16  ;;  %s799_s27 = scalar_lea.hbm %s1202_s4, 48 }
  0x7c   : > { %p796_p3 = scmp.ne.s32.totalorder %s1122_s12, %s795_s11  ;;  %p800_p8 = scmp.lt.u32.totalorder %s1122_s12, %s1202_s4 }
  0x7d   : > { %p801_p13 = scmp.lt.u32.totalorder %s799_s27, %s795_s11  ;;  %p803_p12 = scmp.lt.u32.totalorder %s795_s11, %s1122_s12 }
  0x7e   : > { %p797_p7 = pnand %p796_p3, %p1211_p11 }
  0x7f   : > { %p802_p10 = por %p801_p13, %p800_p8 }
  0x80   : > { %p798_p9 = pneg %p797_p7 }
  0x81   : > { %p804_p0 = por %p803_p12, %p802_p10 }
  0x83   : > { %p805_p2 = pnand %p804_p0, %p798_p9 }
  0x85   : > { %808 = shalt.err (!%p805_p2)
}
  0x86   : > { %643 = dma.vmem_to_hbm [thread:$0]  (%p1211_p11), %s1115_s9, 16, %s1122_s12, %s1124_s14   ;;  %v402_v4 = vmax.f32 %v401_v3, 0.0  ;;  %v414_v6 = vld [vmem:[%s1073_s30] sm:$0x1] }
  0x87   : > { %v415_v10 = vmul.f32 0.95, %v414_v6  ;;  %s298_s24 = scalar_lea.vmem [#allocation11], %s1053_s13  ;;  %s470_s30 = scalar_lea.hbm %s1203_s5, %s634_s17 }
  0x88   : > { %721 = vrsqrt.f32 %v402_v4  ;;  %vm405_vm0 = vcmp.eq.f32.partialorder %v402_v4, inf  ;;  %v408_v8 = vand.u32 2147483648, %v402_v4  ;;  %vm407_vm1 = vcmp.eq.f32.partialorder %v402_v4, 0.0  ;;  %s472_s15 = sshll.u32 %s298_s24, 4  ;;  %s907_s13 = smov [#allocation11]   ;;  %s1150_s15 = int_to_ptr.vmem [resolvable:$true] %s472_s15 }
  0x89   : > { %s809_s25 = scalar_lea.vmem %s1150_s15, 16  ;;  %s813_s11 = sshll.u32 %s907_s13, 4  ;;  %s814_s11 = int_to_ptr.vmem [resolvable:$false] %s813_s11 }
  0x8a   : > { %p810_p4 = scmp.ne.s32.totalorder %s1150_s15, %s809_s25  ;;  %s815_s28 = scalar_lea.vmem %s814_s11, 32 }
  0x8b   : > { %p816_p1 = scmp.lt.s32.totalorder %s1150_s15, %s814_s11  ;;  %p817_p3 = scmp.lt.s32.totalorder %s815_s28, %s809_s25 }
  0x8c   : > { %p811_p5 = pnand %p810_p4, %p1211_p11 }
  0x8d   : > { %p818_p7 = por %p817_p3, %p816_p1 }
  0x8e   : > { %p812_p6 = pneg %p811_p5 }
  0x90   : > { %p819_p9 = pnand %p818_p7, %p812_p6 }
  0x92   : > { %v722_v5 = vpop.eup %721 }
  0x93   : > { %v404_v7 = vmul.f32 %v722_v5, %v402_v4 }
  0x95   : > { %v406_v9 = vsel %vm405_vm0, %v402_v4, %v404_v7 }
  0x96   : > { %v409_v11 = vsel %vm407_vm1, %v408_v8, %v406_v9 }
  0x97   : > { %v416_v12 = vmul.f32 0.05, %v409_v11 }
  0x99   : > { %v417_v13 = vadd.f32 %v416_v12, %v415_v10 }
  0x9b   : > { %418 = vst [vmem:[%s298_s24] sm:$0x1] %v417_v13 }
  0x9c   : > { %822 = shalt.err (!%p819_p9)
}
  0x9d   : > { %s823_s21 = scalar_lea.hbm %s470_s30, 16  ;;  %s827_s27 = scalar_lea.hbm %s1203_s5, 48 }
  0x9e   : > { %p824_p8 = scmp.ne.s32.totalorder %s470_s30, %s823_s21  ;;  %p828_p12 = scmp.lt.u32.totalorder %s470_s30, %s1203_s5 }
  0x9f   : > { %p829_p0 = scmp.lt.u32.totalorder %s827_s27, %s823_s21  ;;  %p831_p4 = scmp.lt.u32.totalorder %s823_s21, %s470_s30 }
  0xa0   : > { %p825_p13 = pnand %p824_p8, %p1211_p11 }
  0xa1   : > { %p830_p2 = por %p829_p0, %p828_p12 }
  0xa2   : > { %p826_p10 = pneg %p825_p13 }
  0xa3   : > { %p832_p5 = por %p831_p4, %p830_p2 }
  0xa5   : > { %p833_p6 = pnand %p832_p5, %p826_p10 }
  0xa7   : > { %836 = shalt.err (!%p833_p6)
}
  0xa8   : > { %644 = dma.vmem_to_hbm [thread:$0]  (%p1211_p11), %s1150_s15, 16, %s470_s30, %s1124_s14  }
  0xa9 PF: > { %p663_p1 = scmp.ge.s32.totalorder %s895_s23, 2  ;;  %s484_s24 = sand.u32 1, %s875_s18  }
  0xaa   : > { %p1212_p3 = scmp.ne.s32.totalorder %s1209_s8, 0  ;;  %s485_s9 = scalar_lea.sflag [#allocation7], %s484_s24 }
  0xac   : > { %p653_p7 = pnand %p663_p1, %p1212_p3 }
  0xae   : > { %866 = dma.done.wait (!%p653_p7), %s485_s9, 768  }
  0xaf   : > { %868 = vsyncadd (!%p653_p7), %s485_s9, 4294966528  ;;  %s1213_s12 = sadd.s32 4294967294, %s895_s23  }
  0xb0   : > { %s493_s25 = sand.u32 1, %s1213_s12  }
  0xb1   : > { %s494_s13 = scalar_lea.sflag [#allocation10], %s493_s25 }
  0xb2   : > { %870 = dma.done.wait (!%p653_p7), %s494_s13, 32  }
  0xb3   : > { %872 = vsyncadd (!%p653_p7), %s494_s13, 4294967264  ;;  %s25_s23 = sadd.s32 1, %s895_s23   ;;  %s1214_s18 = smov %s879_s19 }
  0xb4   : > { %p22_p11 = scmp.ge.s32.totalorder %s25_s23, 5   ;;  %s1215_s19 = smov %s883_s20 }
  0xb5   : > { %s1216_s20 = smov %s1000_s7  ;;  %s1217_s21 = smov %s891_s22 }
  0xb6   : > { %s1218_s22 = smov %s1220_s26  ;;  %24 = sbr.rel (!%p22_p11) target bundleno = 8 (0x8), region = 123 }
  0xbd   :  { %506 = vsyncpa [#allocation6], 1 }
  0xbe   :  { %508 = vsyncpa [#allocation6 + $0x1], 1 }
  0xbf   :  { %509 = vsyncpa [#allocation7], 1 }
  0xc0   :  { %511 = vsyncpa [#allocation7 + $0x1], 1 }
  0xc1   :  { %512 = vsyncpa [#allocation10], 1 }
  0xc2   :  { %514 = vsyncpa [#allocation10 + $0x1], 1 }

</bundles_post_ra>
